<compile_context>
chip_gen: v7x
topology: tpu7x:2x2x1
jax: 0.10.0
libtpu: 0.0.40
codegen_flags: <defaults>
</compile_context>

<pallas_src>
import functools

import jax
import jax.numpy as jnp
from jax.experimental import pallas as pl
from jax.experimental.pallas import tpu as pltpu


# ---------------------------------------------------------------------------
# Kernels
# ---------------------------------------------------------------------------
def _global_feat_kernel(x_ref, w1_ref, b1_ref, w2_ref, b2_ref, w3_ref, b3_ref,
                        g_ref, *, compute_dtype):
    """Encoder conv1..conv3 (BN folded) + running max of h3 over point tiles."""
    cd = compute_dtype
    x = x_ref[0].astype(cd)                                           # (3, TN)
    h1 = jnp.tanh(
        jnp.dot(w1_ref[...], x, preferred_element_type=jnp.float32) + b1_ref[...])
    h2 = jnp.tanh(
        jnp.dot(w2_ref[...], h1.astype(cd), preferred_element_type=jnp.float32)
        + b2_ref[...])
    h3 = (jnp.dot(w3_ref[...], h2.astype(cd), preferred_element_type=jnp.float32)
          + b3_ref[...])                                              # (256, TN)
    tile_max = jnp.max(h3, axis=1, keepdims=True)                     # (256, 1)

    @pl.when(pl.program_id(1) == 0)
    def _():
        g_ref[0] = tile_max

    @pl.when(pl.program_id(1) > 0)
    def _():
        g_ref[0] = jnp.maximum(g_ref[0], tile_max)


def _seg_head_kernel(x_ref, gb_ref, w1_ref, b1_ref, w4p_ref, w5_ref, b5_ref,
                     w6_ref, b6_ref, w7_ref, b7_ref, o_ref, *, compute_dtype):
    """Recompute point features, then the segmentation head per point tile."""
    cd = compute_dtype
    x = x_ref[0].astype(cd)                                           # (3, TN)
    h1 = jnp.tanh(
        jnp.dot(w1_ref[...], x, preferred_element_type=jnp.float32) + b1_ref[...])
    # s1 = tanh(W4_point @ h1 + (W4_global @ g + b4)); global part precomputed.
    s1 = jnp.tanh(
        jnp.dot(w4p_ref[...], h1.astype(cd), preferred_element_type=jnp.float32)
        + gb_ref[0])                                                  # (128, TN)
    s2 = jnp.tanh(
        jnp.dot(w5_ref[...], s1.astype(cd), preferred_element_type=jnp.float32)
        + b5_ref[...])                                                # (64, TN)
    s3 = jnp.tanh(
        jnp.dot(w6_ref[...], s2.astype(cd), preferred_element_type=jnp.float32)
        + b6_ref[...])                                                # (32, TN)
    out = (jnp.dot(w7_ref[...], s3.astype(cd), preferred_element_type=jnp.float32)
           + b7_ref[...])                                             # (k, TN)
    o_ref[0] = out.astype(o_ref.dtype)


# ---------------------------------------------------------------------------
# Wrapper
# ---------------------------------------------------------------------------
def _choose_tile(n, target):
    """Largest multiple of 128 that divides n and is <= target (else n)."""
    if n <= target or n % 128 != 0:
        return n
    t = (min(target, n) // 128) * 128
    while t >= 128:
        if n % t == 0:
            return t
        t -= 128
    return n


def _wspec(arr):
    """BlockSpec for a small, grid-invariant parameter (block == full array)."""
    zeros = (0,) * arr.ndim
    return pl.BlockSpec(arr.shape, lambda b, t: zeros)


def pointnet_partseg(x_bcn, params, *, tile_n=2048, compute_dtype=jnp.float32):
    """x_bcn: (B, 3, N) float32 (PyTorch NCW layout). Returns (B, N, k)."""
    B, C, N = x_bcn.shape
    assert C == 3
    tn = _choose_tile(N, tile_n)
    n_tiles = N // tn
    cd = compute_dtype

    def wb(name):
        w, b = params[name]                       # w: (Cout, Cin), b: (Cout,)
        return w.astype(cd), b[:, None].astype(jnp.float32)

    w1, b1 = wb("e1")
    w2, b2 = wb("e2")
    w3, b3 = wb("e3")
    w4_full, b4_full = params["s1"]               # (128, 272), (128,)
    w4g = w4_full[:, :256]                        # multiplies the global feature
    w4p = w4_full[:, 256:].astype(cd)             # multiplies pointfeat (h1)
    w5, b5 = wb("s2")
    w6, b6 = wb("s3")
    w7, b7 = wb("s4")
    k = w7.shape[0]

    x_spec = pl.BlockSpec((1, 3, tn), lambda b, t: (b, 0, t))

    # ---- pass 1: global feature (running max over point tiles) --------------
    gmax = pl.pallas_call(
        functools.partial(_global_feat_kernel, compute_dtype=cd),
        out_shape=jax.ShapeDtypeStruct((B, 256, 1), jnp.float32),
        grid_spec=pltpu.PrefetchScalarGridSpec(
            num_scalar_prefetch=0,
            grid=(B, n_tiles),
            in_specs=[x_spec, _wspec(w1), _wspec(b1), _wspec(w2), _wspec(b2),
                      _wspec(w3), _wspec(b3)],
            out_specs=pl.BlockSpec((1, 256, 1), lambda b, t: (b, 0, 0)),
        ),
        compiler_params=pltpu.CompilerParams(
            dimension_semantics=("parallel", "arbitrary")),
    )(x_bcn, w1, b1, w2, b2, w3, b3)

    # ---- plain-JAX glue: row-constant global feature folded into a bias -----
    g = gmax[:, :, 0]                                                 # (B, 256)
    gbias = jnp.einsum("oc,bc->bo", w4g, g) + b4_full[None, :]        # (B, 128)
    gbias = gbias[:, :, None].astype(jnp.float32)                     # (B, 128, 1)

    # ---- pass 2: segmentation head, tiles fully independent -----------------
    out_ckn = pl.pallas_call(
        functools.partial(_seg_head_kernel, compute_dtype=cd),
        out_shape=jax.ShapeDtypeStruct((B, k, N), jnp.float32),
        grid_spec=pltpu.PrefetchScalarGridSpec(
            num_scalar_prefetch=0,
            grid=(B, n_tiles),
            in_specs=[x_spec,
                      pl.BlockSpec((1, 128, 1), lambda b, t: (b, 0, 0)),
                      _wspec(w1), _wspec(b1), _wspec(w4p), _wspec(w5), _wspec(b5),
                      _wspec(w6), _wspec(b6), _wspec(w7), _wspec(b7)],
            out_specs=pl.BlockSpec((1, k, tn), lambda b, t: (b, 0, t)),
        ),
        compiler_params=pltpu.CompilerParams(
            dimension_semantics=("parallel", "parallel")),
    )(x_bcn, gbias, w1, b1, w4p, w5, b5, w6, b6, w7, b7)

    # match PyTorch's returned layout (B, N, k)
    return jnp.transpose(out_ckn, (0, 2, 1))


# ---------------------------------------------------------------------------
# Parameters (eval-mode BN folded) and pure-JAX reference
# ---------------------------------------------------------------------------
def _fold_bn(w_oc_ic, bias_oc, gamma, beta, mean, var, eps=1e-5):
    scale = gamma / jnp.sqrt(var + eps)                               # (Cout,)
    return w_oc_ic * scale[:, None], (bias_oc - mean) * scale + beta


_LAYER_DEFS = (
    ("e1", 3, 16, True),
    ("e2", 16, 32, True),
    ("e3", 32, 256, True),
    ("s1", 272, 128, True),
    ("s2", 128, 64, True),
    ("s3", 64, 32, True),
    ("s4", 32, None, False),     # Cout = num_class, no BN
)


def init_params(key, num_class=4):
    """Deterministic synthetic parameters matching PointNetPartSeg's shapes."""
    params = {}
    keys = jax.random.split(key, len(_LAYER_DEFS))
    for (name, cin, cout, has_bn), kl in zip(_LAYER_DEFS, keys):
        cout = num_class if cout is None else cout
        kw, kb, kg, kbeta, km, kv = jax.random.split(kl, 6)
        w = 0.1 * jax.random.normal(kw, (cout, cin), jnp.float32)     # Conv1d (Cout,Cin,1) squeezed
        b = 0.1 * jax.random.normal(kb, (cout,), jnp.float32)
        if has_bn:
            gamma = 1.0 + 0.1 * jax.random.normal(kg, (cout,), jnp.float32)
            beta = 0.1 * jax.random.normal(kbeta, (cout,), jnp.float32)
            mean = 0.1 * jax.random.normal(km, (cout,), jnp.float32)
            var = 1.0 + 0.5 * jax.random.uniform(kv, (cout,), jnp.float32)
            params[name] = _fold_bn(w, b, gamma, beta, mean, var)
        else:
            params[name] = (w, b)
    return params


def reference_forward(x_bcn, params):
    """Pure-JAX reference mirroring the torch graph (with folded BN weights)."""
    def conv(h, name):
        w, b = params[name]
        return jnp.einsum("oc,bcn->bon", w, h) + b[None, :, None]

    h1 = jnp.tanh(conv(x_bcn, "e1"))
    pointfeat = h1
    h2 = jnp.tanh(conv(h1, "e2"))
    h3 = conv(h2, "e3")
    g = jnp.max(h3, axis=2, keepdims=True)                            # max over points
    g = jnp.broadcast_to(g, h3.shape)
    feat = jnp.concatenate([g, pointfeat], axis=1)                    # (B, 272, N)
    s1 = jnp.tanh(conv(feat, "s1"))
    s2 = jnp.tanh(conv(s1, "s2"))
    s3 = jnp.tanh(conv(s2, "s3"))
    out = conv(s3, "s4")                                              # (B, k, N)
    return jnp.transpose(out, (0, 2, 1))                              # (B, N, k)


if __name__ == "__main__":
    key = jax.random.PRNGKey(0)
    k_x, k_p = jax.random.split(key)

    B, N, num_class = 2, 512, 4
    x = jax.random.normal(k_x, (B, 3, N), jnp.float32)                # PyTorch layout (B, 3, N)
    params = init_params(k_p, num_class=num_class)

    ref = reference_forward(x, params)

    # f32 path: strict check (small tile to exercise the multi-tile running max).
    out = jax.block_until_ready(pointnet_partseg(x, params, tile_n=128))
    assert out.shape == (B, N, num_class), out.shape
    assert jnp.allclose(out, ref, atol=1e-4, rtol=1e-4), float(jnp.max(jnp.abs(out - ref)))

    # bf16-matmul path (v6e/v7x MXU lever): loose sanity check vs the f32 reference.
    out_bf16 = jax.block_until_ready(
        pointnet_partseg(x, params, tile_n=128, compute_dtype=jnp.bfloat16))
    err_bf16 = float(jnp.max(jnp.abs(out_bf16 - ref)))
    assert err_bf16 < 0.2, err_bf16

    print("KERNEL_OK")
</pallas_src>

<mosaic_0001>
module attributes {stable_mosaic.version = 11 : i64} {
  func.func @_global_feat_kernel(%arg0: i32, %arg1: i32, %arg2: memref<1x3x128xf32, #tpu.memory_space<vmem>>, %arg3: memref<16x3xf32, #tpu.memory_space<vmem>>, %arg4: memref<16x1xf32, #tpu.memory_space<vmem>>, %arg5: memref<32x16xf32, #tpu.memory_space<vmem>>, %arg6: memref<32x1xf32, #tpu.memory_space<vmem>>, %arg7: memref<256x32xf32, #tpu.memory_space<vmem>>, %arg8: memref<256x1xf32, #tpu.memory_space<vmem>>, %arg9: memref<1x256x1xf32, #tpu.memory_space<vmem>>) attributes {dimension_semantics = [#tpu.dimension_semantics<parallel>, #tpu.dimension_semantics<arbitrary>], iteration_bounds = array<i64: 2, 4>, scalar_prefetch = 0 : i64, scratch_operands = 0 : i64, tpu.core_type = #tpu.core_type<tc>, window_params = [{transform_indices = @transform_0, window_bounds = array<i64: 1, 3, 128>}, {pipeline_mode = #tpu.pipeline_mode<synchronous>, transform_indices = @transform_1, window_bounds = array<i64: 16, 3>}, {pipeline_mode = #tpu.pipeline_mode<synchronous>, transform_indices = @transform_2, window_bounds = array<i64: 16, 1>}, {pipeline_mode = #tpu.pipeline_mode<synchronous>, transform_indices = @transform_3, window_bounds = array<i64: 32, 16>}, {pipeline_mode = #tpu.pipeline_mode<synchronous>, transform_indices = @transform_4, window_bounds = array<i64: 32, 1>}, {pipeline_mode = #tpu.pipeline_mode<synchronous>, transform_indices = @transform_5, window_bounds = array<i64: 256, 32>}, {pipeline_mode = #tpu.pipeline_mode<synchronous>, transform_indices = @transform_6, window_bounds = array<i64: 256, 1>}, {transform_indices = @transform_7, window_bounds = array<i64: 1, 256, 1>}]} {
    %c0 = arith.constant 0 : index
    %c0_0 = arith.constant 0 : index
    %c0_1 = arith.constant 0 : index
    %0 = vector.load %arg2[%c0, %c0_0, %c0_1] : memref<1x3x128xf32, #tpu.memory_space<vmem>>, vector<1x3x128xf32>
    %1 = vector.shape_cast %0 : vector<1x3x128xf32> to vector<3x128xf32>
    %c0_2 = arith.constant 0 : index
    %c0_3 = arith.constant 0 : index
    %2 = vector.load %arg3[%c0_2, %c0_3] : memref<16x3xf32, #tpu.memory_space<vmem>>, vector<16x3xf32>
    %cst = arith.constant dense<0.000000e+00> : vector<16x128xf32>
    %3 = tpu.matmul %2, %1, %cst {dimension_numbers = #tpu.dot_dimension_numbers<[1], [0], [0], [1], [0, 0, 1, 1], [], []>} : vector<16x3xf32>, vector<3x128xf32>, vector<16x128xf32> -> vector<16x128xf32>
    %c0_4 = arith.constant 0 : index
    %c0_5 = arith.constant 0 : index
    %4 = vector.load %arg4[%c0_4, %c0_5] : memref<16x1xf32, #tpu.memory_space<vmem>>, vector<16x1xf32>
    %5 = vector.broadcast %4 : vector<16x1xf32> to vector<16x128xf32>
    %6 = arith.addf %3, %5 : vector<16x128xf32>
    %7 = math.tanh %6 : vector<16x128xf32>
    %c0_6 = arith.constant 0 : index
    %c0_7 = arith.constant 0 : index
    %8 = vector.load %arg5[%c0_6, %c0_7] : memref<32x16xf32, #tpu.memory_space<vmem>>, vector<32x16xf32>
    %cst_8 = arith.constant dense<0.000000e+00> : vector<32x128xf32>
    %9 = tpu.matmul %8, %7, %cst_8 {dimension_numbers = #tpu.dot_dimension_numbers<[1], [0], [0], [1], [0, 0, 1, 1], [], []>} : vector<32x16xf32>, vector<16x128xf32>, vector<32x128xf32> -> vector<32x128xf32>
    %c0_9 = arith.constant 0 : index
    %c0_10 = arith.constant 0 : index
    %10 = vector.load %arg6[%c0_9, %c0_10] : memref<32x1xf32, #tpu.memory_space<vmem>>, vector<32x1xf32>
    %11 = vector.broadcast %10 : vector<32x1xf32> to vector<32x128xf32>
    %12 = arith.addf %9, %11 : vector<32x128xf32>
    %13 = math.tanh %12 : vector<32x128xf32>
    %c0_11 = arith.constant 0 : index
    %c0_12 = arith.constant 0 : index
    %14 = vector.load %arg7[%c0_11, %c0_12] : memref<256x32xf32, #tpu.memory_space<vmem>>, vector<256x32xf32>
    %cst_13 = arith.constant dense<0.000000e+00> : vector<256x128xf32>
    %15 = tpu.matmul %14, %13, %cst_13 {dimension_numbers = #tpu.dot_dimension_numbers<[1], [0], [0], [1], [0, 0, 1, 1], [], []>} : vector<256x32xf32>, vector<32x128xf32>, vector<256x128xf32> -> vector<256x128xf32>
    %c0_14 = arith.constant 0 : index
    %c0_15 = arith.constant 0 : index
    %16 = vector.load %arg8[%c0_14, %c0_15] : memref<256x1xf32, #tpu.memory_space<vmem>>, vector<256x1xf32>
    %17 = vector.broadcast %16 : vector<256x1xf32> to vector<256x128xf32>
    %18 = arith.addf %15, %17 : vector<256x128xf32>
    %cst_16 = arith.constant dense<0xFF800000> : vector<256xf32>
    %19 = vector.multi_reduction <maximumf>, %18, %cst_16 [1] : vector<256x128xf32> to vector<256xf32>
    %20 = vector.shape_cast %19 : vector<256xf32> to vector<256x1xf32>
    %c0_i32 = arith.constant 0 : i32
    %21 = arith.cmpi eq, %arg1, %c0_i32 : i32
    %22 = arith.extui %21 : i1 to i32
    %c0_i32_17 = arith.constant 0 : i32
    %23 = arith.cmpi ne, %22, %c0_i32_17 : i32
    scf.if %23 {
      %c0_20 = arith.constant 0 : index
      %c0_21 = arith.constant 0 : index
      %c0_22 = arith.constant 0 : index
      %27 = vector.load %arg9[%c0_20, %c0_21, %c0_22] : memref<1x256x1xf32, #tpu.memory_space<vmem>>, vector<1x256x1xf32>
      %28 = vector.shape_cast %27 : vector<1x256x1xf32> to vector<256x1xf32>
      %29 = vector.shape_cast %20 : vector<256x1xf32> to vector<1x256x1xf32>
      tpu.vector_store %arg9[%c0_20, %c0_21, %c0_22], %29 {strides = array<i32>} : memref<1x256x1xf32, #tpu.memory_space<vmem>>, vector<1x256x1xf32>,
    } else {
    }
    %c0_i32_18 = arith.constant 0 : i32
    %24 = arith.cmpi sgt, %arg1, %c0_i32_18 : i32
    %25 = arith.extui %24 : i1 to i32
    %c0_i32_19 = arith.constant 0 : i32
    %26 = arith.cmpi ne, %25, %c0_i32_19 : i32
    scf.if %26 {
      %c0_20 = arith.constant 0 : index
      %c0_21 = arith.constant 0 : index
      %c0_22 = arith.constant 0 : index
      %27 = vector.load %arg9[%c0_20, %c0_21, %c0_22] : memref<1x256x1xf32, #tpu.memory_space<vmem>>, vector<1x256x1xf32>
      %28 = vector.shape_cast %27 : vector<1x256x1xf32> to vector<256x1xf32>
      %29 = arith.maximumf %28, %20 : vector<256x1xf32>
      %c0_23 = arith.constant 0 : index
      %c0_24 = arith.constant 0 : index
      %c0_25 = arith.constant 0 : index
      %30 = vector.load %arg9[%c0_23, %c0_24, %c0_25] : memref<1x256x1xf32, #tpu.memory_space<vmem>>, vector<1x256x1xf32>
      %31 = vector.shape_cast %30 : vector<1x256x1xf32> to vector<256x1xf32>
      %32 = vector.shape_cast %29 : vector<256x1xf32> to vector<1x256x1xf32>
      tpu.vector_store %arg9[%c0_23, %c0_24, %c0_25], %32 {strides = array<i32>} : memref<1x256x1xf32, #tpu.memory_space<vmem>>, vector<1x256x1xf32>,
    } else {
    }
    return
  }
  func.func @transform_0(%arg0: i32, %arg1: i32) -> (i32, i32, i32) {
    %c0_i32 = arith.constant 0 : i32
    %c0_i32_0 = arith.constant 0 : i32
    return %arg0, %c0_i32, %arg1 : i32, i32, i32
  }
  func.func @transform_1(%arg0: i32, %arg1: i32) -> (i32, i32) {
    %c0_i32 = arith.constant 0 : i32
    %c0_i32_0 = arith.constant 0 : i32
    %c0_i32_1 = arith.constant 0 : i32
    return %c0_i32, %c0_i32_0 : i32, i32
  }
  func.func @transform_2(%arg0: i32, %arg1: i32) -> (i32, i32) {
    %c0_i32 = arith.constant 0 : i32
    %c0_i32_0 = arith.constant 0 : i32
    %c0_i32_1 = arith.constant 0 : i32
    return %c0_i32, %c0_i32_0 : i32, i32
  }
  func.func @transform_3(%arg0: i32, %arg1: i32) -> (i32, i32) {
    %c0_i32 = arith.constant 0 : i32
    %c0_i32_0 = arith.constant 0 : i32
    %c0_i32_1 = arith.constant 0 : i32
    return %c0_i32, %c0_i32_0 : i32, i32
  }
  func.func @transform_4(%arg0: i32, %arg1: i32) -> (i32, i32) {
    %c0_i32 = arith.constant 0 : i32
    %c0_i32_0 = arith.constant 0 : i32
    %c0_i32_1 = arith.constant 0 : i32
    return %c0_i32, %c0_i32_0 : i32, i32
  }
  func.func @transform_5(%arg0: i32, %arg1: i32) -> (i32, i32) {
    %c0_i32 = arith.constant 0 : i32
    %c0_i32_0 = arith.constant 0 : i32
    %c0_i32_1 = arith.constant 0 : i32
    return %c0_i32, %c0_i32_0 : i32, i32
  }
  func.func @transform_6(%arg0: i32, %arg1: i32) -> (i32, i32) {
    %c0_i32 = arith.constant 0 : i32
    %c0_i32_0 = arith.constant 0 : i32
    %c0_i32_1 = arith.constant 0 : i32
    return %c0_i32, %c0_i32_0 : i32, i32
  }
  func.func @transform_7(%arg0: i32, %arg1: i32) -> (i32, i32, i32) {
    %c0_i32 = arith.constant 0 : i32
    %c0_i32_0 = arith.constant 0 : i32
    %c0_i32_1 = arith.constant 0 : i32
    return %arg0, %c0_i32, %c0_i32_0 : i32, i32, i32
  }
}

</mosaic_0001>

<bundles_post_ra>
// kernel: tpu_custom_call.1
= control target key start
LH: loop header
LB: loop body
LE: loop exit
PB: predicated region body
PF: predicated region fallthrough
CT: control target
= control target key end

     0   :  { %s1676_s24 = smov 0   ;;  %s1678_s25 = smov 0   ;;  %s2322_s0 = inlined_call_operand.vmem [shape: f32[2,3,512], index: 0, kind: input, shape index: {}]   ;;  %s2323_s1 = inlined_call_operand.vmem [shape: f32[16,3], index: 1, kind: input, shape index: {}]   ;;  %s2324_s2 = inlined_call_operand.vmem [shape: f32[16,1], index: 2, kind: input, shape index: {}]   ;;  %s2325_s3 = inlined_call_operand.vmem [shape: f32[32,16], index: 3, kind: input, shape index: {}]   ;;  %s2326_s4 = inlined_call_operand.vmem [shape: f32[32,1], index: 4, kind: input, shape index: {}]   ;;  %s2327_s5 = inlined_call_operand.vmem [shape: f32[256,32], index: 5, kind: input, shape index: {}]   ;;  %s2328_s6 = inlined_call_operand.vmem [shape: f32[256,1], index: 6, kind: input, shape index: {}]   ;;  %s2329_s7 = inlined_call_operand.vmem [shape: f32[2,256,1], index: 7, kind: output, shape index: {}]  }
   0x1   :  { %s1680_s26 = smov 0   ;;  %s1682_s27 = smov 0  }
   0x2   :  { %s1684_s28 = smov 0  }
   0x3 LB: > { %s26_s29 = sadd.s32 1, %s1625_s26  ;;  %s29_s30 = sadd.s32 1, %s1629_s27  ;;  %s1633_s28 = sphi %s1684_s28, %s17_s28   ;;  %s1629_s27 = sphi %s1682_s27, %s2333_s27   ;;  %s1625_s26 = sphi %s1680_s26, %s2332_s26   ;;  %s1621_s25 = sphi %s1678_s25, %s2331_s25   ;;  %s1617_s24 = sphi %s1676_s24, %s2330_s24  }
   0x4   : > { %p27_p0 = scmp.ge.s32.totalorder %s26_s29, 4  ;;  %p1359_p1 = scmp.ge.s32.totalorder %s1633_s28, 1 }
   0x5   : > { %p254_p2 = scmp.lt.s32.totalorder %s1633_s28, 9 }
   0x6   : > { %s2335_s29 = smov (%p27_p0, %s26_s29), 0  ;;  %s2337_s30 = smov (!%p27_p0, %s29_s30), %s1629_s27 }
   0x7   : > { %p255_p3 = pnand %p1359_p1, %p254_p2  ;;  %p31_p4 = scmp.ge.s32.totalorder %s2337_s30, 2 }
   0x8   : > { %p289_p5 = scmp.lt.s32.totalorder (!%p255_p3), %s1621_s25, 1  ;;  %p291_p6 = scmp.lt.s32.totalorder (!%p255_p3), %s1617_s24, 3  ;;  %v303_v0 = vld [vmem:[%s2323_s1] sm:$0xff] (!%p255_p3)  ;;  %vm317_vm0 = vcmask (!%p255_p3), 23552   ;;  %v1635_v2 = vmov (!%p255_p3), 0   ;;  %v306_v3 = vld [vmem:[%s2324_s2 + $0x8] sm:$0xff] (!%p255_p3) }
   0x9   : > { %s2339_s30 = smov (%p31_p4, %s2337_s30), 0  ;;  %258 = sbr.rel (%p255_p3) target bundleno = 934 (0x3a6), region = 48 }
   0xa   : > { %1455 = vmatprep.mubr.msk.f32.mxu1 (!%p255_p3), %vm317_vm0, %v303_v0  ;;  %v305_v1 = vld [vmem:[%s2324_s2] sm:$0xff] (!%p255_p3)  ;;  %1581 = vset.pattern.permute.xlu0 (!%p255_p3), %v1635_v2  ;;  %vm324_vm1 = vcmask (!%p255_p3), 1042432   ;;  %v304_v5 = vld [vmem:[%s2323_s1 + $0x8] sm:$0xff] (!%p255_p3)  ;;  %v411_v6 = vld [vmem:[%s2326_s4 + $0x10] sm:$0xff] (!%p255_p3)  ;;  %vm433_vm2 = vcmask (!%p255_p3), 130048   ;;  %vm759_vm3 = vcmask (!%p255_p3), 261120  }
   0xb   : > { %1582 = vset.pattern.permute.xlu1 (!%p255_p3), %v1635_v2  ;;  %309 = vperm.xlu0 (!%p255_p3), %1581, %v305_v1   ;;  %v567_v7 = vld [vmem:[%s2328_s6] sm:$0xff] (!%p255_p3)  ;;  %v569_v8 = vld [vmem:[%s2328_s6 + $0x10] sm:$0xff] (!%p255_p3)  ;;  %v410_v25 = vld [vmem:[%s2326_s4 + $0x8] sm:$0xff] (!%p255_p3)  ;;  %p1403_p7 = scmp.ne.s32.totalorder (!%p255_p3), %s1617_s24, 0 }
   0xc   : > { %v571_v9 = vld [vmem:[%s2328_s6 + $0x20] sm:$0xff] (!%p255_p3)  ;;  %v573_v10 = vld [vmem:[%s2328_s6 + $0x30] sm:$0xff] (!%p255_p3)  ;;  %v412_v26 = vld [vmem:[%s2326_s4 + $0x18] sm:$0xff] (!%p255_p3) }
   0xd   : > { %v575_v11 = vld [vmem:[%s2328_s6 + $0x40] sm:$0xff] (!%p255_p3)  ;;  %v577_v12 = vld [vmem:[%s2328_s6 + $0x50] sm:$0xff] (!%p255_p3)  ;;  %v568_v27 = vld [vmem:[%s2328_s6 + $0x8] sm:$0xff] (!%p255_p3) }
   0xe   : > { %v579_v13 = vld [vmem:[%s2328_s6 + $0x60] sm:$0xff] (!%p255_p3)  ;;  %v581_v14 = vld [vmem:[%s2328_s6 + $0x70] sm:$0xff] (!%p255_p3)  ;;  %v570_v28 = vld [vmem:[%s2328_s6 + $0x18] sm:$0xff] (!%p255_p3) }
   0xf   : > { %314 = vperm.xlu0 (!%p255_p3), %1581, %v306_v3   ;;  %v583_v15 = vld [vmem:[%s2328_s6 + $0x80] sm:$0xff] (!%p255_p3)  ;;  %v585_v16 = vld [vmem:[%s2328_s6 + $0x90] sm:$0xff] (!%p255_p3)  ;;  %v572_v29 = vld [vmem:[%s2328_s6 + $0x28] sm:$0xff] (!%p255_p3) }
  0x10   : > { %s2341_s25 = smov (!%p289_p5, %s1621_s25), 1  ;;  %v587_v17 = vld [vmem:[%s2328_s6 + $0xa0] sm:$0xff]  ;;  %v589_v18 = vld [vmem:[%s2328_s6 + $0xb0] sm:$0xff]  ;;  %v574_v30 = vld [vmem:[%s2328_s6 + $0x38] sm:$0xff]  ;;  %vm1149_vm4 = vcmask (!%p1403_p7), 7168  }
  0x11   : > { %s292_s12 = scalar_select %p291_p6, %s1617_s24, 3  ;;  %v591_v19 = vld [vmem:[%s2328_s6 + $0xc0] sm:$0xff]  ;;  %v593_v20 = vld [vmem:[%s2328_s6 + $0xd0] sm:$0xff]  ;;  %v576_v31 = vld [vmem:[%s2328_s6 + $0x48] sm:$0xff] }
  0x12   : > { %s1360_s13 = sshll.u32 %s2341_s25, 2  ;;  %s1407_s14 = sshll.u32 %s2341_s25, 8  ;;  %v595_v21 = vld [vmem:[%s2328_s6 + $0xe0] sm:$0xff]  ;;  %v597_v22 = vld [vmem:[%s2328_s6 + $0xf0] sm:$0xff]  ;;  %v578_v32 = vld [vmem:[%s2328_s6 + $0x58] sm:$0xff] }
  0x13   : > { %s294_s17 = sadd.s32 %s1360_s13, %s292_s12  ;;  %s1723_s20 = scalar_lea.vmem %s2329_s7, %s1407_s14  ;;  %425 = vperm.xlu0 %1581, %v411_v6   ;;  %v405_v23 = vld [vmem:[%s2325_s3] sm:$0xff]  ;;  %v580_v33 = vld [vmem:[%s2328_s6 + $0x68] sm:$0xff]  ;;  %v582_v34 = vld [vmem:[%s2328_s6 + $0x78] sm:$0xff] }
  0x14   : > { %s1361_s21 = sshll.u32 %s294_s17, 2  ;;  %v409_v24 = vld [vmem:[%s2326_s4] sm:$0xff]  ;;  %v584_v35 = vld [vmem:[%s2328_s6 + $0x88] sm:$0xff]  ;;  %v586_v36 = vld [vmem:[%s2328_s6 + $0x98] sm:$0xff] }
  0x15   : > { %s296_s8 = scalar_lea.vmem %s2322_s0, %s1361_s21  ;;  %415 = vperm.xlu1 %1582, %v409_v24   ;;  %v588_v37 = vld [vmem:[%s2328_s6 + $0xa8] sm:$0xff]  ;;  %v590_v38 = vld [vmem:[%s2328_s6 + $0xb8] sm:$0xff]  ;;  %v407_v53 = vld [vmem:[%s2325_s3 + $0x10] sm:$0xff] }
  0x16   : > { %v302_v4 = vld [vmem:[%s296_s8] sm:$0x7]  ;;  %v592_v39 = vld [vmem:[%s2328_s6 + $0xc8] sm:$0xff]  ;;  %v594_v40 = vld [vmem:[%s2328_s6 + $0xd8] sm:$0xff] }
  0x17   : > { %1453 = vmatprep.subr.msk.mxu1 %vm324_vm1, %v302_v4  ;;  %601 = vperm.xlu0 %1581, %v567_v7   ;;  %v596_v41 = vld [vmem:[%s2328_s6 + $0xe8] sm:$0xff]  ;;  %v598_v42 = vld [vmem:[%s2328_s6 + $0xf8] sm:$0xff]  ;;  %v535_v55 = vld [vmem:[%s2327_s5] sm:$0xff] }
  0x18   : > { %1454 = vmatpush3.msk.msra.mxu1 %vm324_vm1, %v302_v4  ;;  %v406_v52 = vld [vmem:[%s2325_s3 + $0x8] sm:$0xff]  ;;  %v408_v54 = vld [vmem:[%s2325_s3 + $0x18] sm:$0xff]  ;;  %v553_v56 = vld [vmem:[%s2327_s5 + $0x90] sm:$0xff]  ;;  %1476 = vmatprep.mubr.msk.f32.mxu0 %vm759_vm3, %v535_v55 }
  0x19   : > { %1456 = vmatmul.mubr.msk.f32.vlgmr.msra.gmra.mrb[0].mxu1 %vm317_vm0, %v304_v5  ;;  %420 = vperm.xlu1 %1582, %v410_v25   ;;  %v560_v24 = vld [vmem:[%s2327_s5 + $0xc8] sm:$0xff]  ;;  %v543_v25 = vld [vmem:[%s2327_s5 + $0x40] sm:$0xff] }
  0x1a   : > { %1462 = vmatprep.mubr.msk.f32.mxu1 %vm433_vm2, %v405_v23  ;;  %v542_v23 = vld [vmem:[%s2327_s5 + $0x38] sm:$0xff] }
  0x1b   : > { %611 = vperm.xlu0 %1581, %v569_v8  }
  0x1d   : > { %430 = vperm.xlu1 %1582, %v412_v26   ;;  %v561_v26 = vld [vmem:[%s2327_s5 + $0xd0] sm:$0xff] }
  0x1f   : > { %621 = vperm.xlu0 %1581, %v571_v9  }
  0x21   : > { %606 = vperm.xlu1 %1582, %v568_v27   ;;  %v544_v27 = vld [vmem:[%s2327_s5 + $0x48] sm:$0xff] }
  0x23   : > { %631 = vperm.xlu0 %1581, %v573_v10  }
  0x25   : > { %616 = vperm.xlu1 %1582, %v570_v28   ;;  %v562_v28 = vld [vmem:[%s2327_s5 + $0xd8] sm:$0xff] }
  0x27   : > { %641 = vperm.xlu0 %1581, %v575_v11   ;;  %v536_v11 = vld [vmem:[%s2327_s5 + $0x8] sm:$0xff] }
  0x29   : > { %626 = vperm.xlu1 %1582, %v572_v29   ;;  %v545_v29 = vld [vmem:[%s2327_s5 + $0x50] sm:$0xff] }
  0x2b   : > { %651 = vperm.xlu0 %1581, %v577_v12   ;;  %v554_v12 = vld [vmem:[%s2327_s5 + $0x98] sm:$0xff] }
  0x2d   : > { %636 = vperm.xlu1 %1582, %v574_v30   ;;  %v563_v30 = vld [vmem:[%s2327_s5 + $0xe0] sm:$0xff] }
  0x2f   : > { %661 = vperm.xlu0 %1581, %v579_v13   ;;  %v537_v13 = vld [vmem:[%s2327_s5 + $0x10] sm:$0xff] }
  0x31   : > { %646 = vperm.xlu1 %1582, %v576_v31   ;;  %v546_v31 = vld [vmem:[%s2327_s5 + $0x58] sm:$0xff] }
  0x33   : > { %671 = vperm.xlu0 %1581, %v581_v14   ;;  %v555_v14 = vld [vmem:[%s2327_s5 + $0xa0] sm:$0xff] }
  0x35   : > { %656 = vperm.xlu1 %1582, %v578_v32   ;;  %v564_v32 = vld [vmem:[%s2327_s5 + $0xe8] sm:$0xff] }
  0x37   : > { %681 = vperm.xlu0 %1581, %v583_v15   ;;  %v538_v15 = vld [vmem:[%s2327_s5 + $0x18] sm:$0xff] }
  0x39   : > { %666 = vperm.xlu1 %1582, %v580_v33   ;;  %v547_v33 = vld [vmem:[%s2327_s5 + $0x60] sm:$0xff] }
  0x3b   : > { %691 = vperm.xlu0 %1581, %v585_v16   ;;  %v556_v16 = vld [vmem:[%s2327_s5 + $0xa8] sm:$0xff] }
  0x3d   : > { %676 = vperm.xlu1 %1582, %v582_v34   ;;  %v565_v34 = vld [vmem:[%s2327_s5 + $0xf0] sm:$0xff] }
  0x3f   : > { %701 = vperm.xlu0 %1581, %v587_v17   ;;  %v539_v17 = vld [vmem:[%s2327_s5 + $0x20] sm:$0xff] }
  0x41   : > { %686 = vperm.xlu1 %1582, %v584_v35   ;;  %v548_v35 = vld [vmem:[%s2327_s5 + $0x68] sm:$0xff] }
  0x43   : > { %711 = vperm.xlu0 %1581, %v589_v18   ;;  %v557_v18 = vld [vmem:[%s2327_s5 + $0xb0] sm:$0xff] }
  0x45   : > { %696 = vperm.xlu1 %1582, %v586_v36   ;;  %v566_v36 = vld [vmem:[%s2327_s5 + $0xf8] sm:$0xff] }
  0x47   : > { %721 = vperm.xlu0 %1581, %v591_v19   ;;  %v540_v19 = vld [vmem:[%s2327_s5 + $0x28] sm:$0xff] }
  0x49   : > { %706 = vperm.xlu1 %1582, %v588_v37   ;;  %v549_v37 = vld [vmem:[%s2327_s5 + $0x70] sm:$0xff] }
  0x4b   : > { %731 = vperm.xlu0 %1581, %v593_v20   ;;  %v558_v20 = vld [vmem:[%s2327_s5 + $0xb8] sm:$0xff] }
  0x4d   : > { %716 = vperm.xlu1 %1582, %v590_v38   ;;  %v550_v38 = vld [vmem:[%s2327_s5 + $0x78] sm:$0xff] }
  0x4f   : > { %741 = vperm.xlu0 %1581, %v595_v21   ;;  %v541_v21 = vld [vmem:[%s2327_s5 + $0x30] sm:$0xff] }
  0x51   : > { %726 = vperm.xlu1 %1582, %v592_v39   ;;  %v551_v39 = vld [vmem:[%s2327_s5 + $0x80] sm:$0xff] }
  0x53   : > { %751 = vperm.xlu0 %1581, %v597_v22   ;;  %v559_v22 = vld [vmem:[%s2327_s5 + $0xc0] sm:$0xff] }
  0x55   : > { %736 = vperm.xlu1 %1582, %v594_v40   ;;  %v552_v40 = vld [vmem:[%s2327_s5 + $0x88] sm:$0xff] }
  0x59   : > { %746 = vperm.xlu1 %1582, %v596_v41  }
  0x5d   : > { %756 = vperm.xlu1 %1582, %v598_v42  }
  0x8a   : > { %v310_v43 = vpop.permute.xlu0 %309 }
  0x8e   : > { %v315_v44 = vpop.permute.xlu0 %314 }
  0x92   : > { %v426_v1 = vpop.permute.xlu0 %425 }
  0x94   : > { %v416_v57 = vpop.permute.xlu1 %415 }
  0x96   : > { %v602_v41 = vpop.permute.xlu0 %601 }
  0x98   : > { %v421_v58 = vpop.permute.xlu1 %420 }
  0x9c   : > { %v431_v63 = vpop.permute.xlu1 %430 }
  0xa0   : > { %v607_v42 = vpop.permute.xlu1 %606 }
  0xec   : > { %v1457_v45 = vpop.f32.mrb[0].mxu1 }
  0xed   : > { %v400_v46 = vadd.f32 %v1457_v45, %v315_v44  ;;  %v394_v47 = vpop.f32.mrb[1].mxu1  ;;  %v617_v44 = vpop.permute.xlu1 %616 }
  0xee   : > { %v395_v48 = vadd.f32 %v394_v47, %v310_v43  ;;  %v612_v43 = vpop.permute.xlu0 %611 }
  0xef   : > { %1583 = vtanh.f32 %v400_v46 }
  0xf0   : > { %1585 = vtanh.f32 %v395_v48 }
  0xf1   : > { %v627_v46 = vpop.permute.xlu1 %626 }
  0xf2   : > { %v622_v45 = vpop.permute.xlu0 %621 }
  0xf5   : > { %v1984_v48 = vpop.permute.xlu1 %636 }
  0xf6   : > { %v632_v47 = vpop.permute.xlu0 %631 }
  0xf9   : > { %v1584_v49 = vpop.eup %1583 }
  0xfa   : > { %v1586_v50 = vpop.eup %1585 }
  0xfb   : > { %v1524_v51 = vpack.c.bf16 %v1584_v49, %v1586_v50  ;;  %v1986_v49 = vpop.permute.xlu0 %641  ;;  %v1988_v50 = vpop.permute.xlu1 %646 }
  0xfd   : > { %1525 = vmatprep.subr.bf16.mxu1 %v1524_v51 }
  0xfe   : > { %1527 = vmatpush3.bf16.msra.mxu1 %v1524_v51 }
  0xff   : > { %v1990_v51 = vpop.permute.xlu0 %651 }
 0x101   : > { %1463 = vmatmul.mubr.msk.f32.vlgmr.msra.gmra.mrb[2].mxu1 %vm433_vm2, %v406_v52  ;;  %v1992_v52 = vpop.permute.xlu1 %656 }
 0x102   : > { %1465 = vmatprep.mubr.msk.f32.mxu1 %vm433_vm2, %v407_v53 }
 0x103   : > { %v1994_v53 = vpop.permute.xlu0 %661 }
 0x105   : > { %1466 = vmatmul.mubr.msk.f32.gmra.mrb[4].mxu1 %vm433_vm2, %v408_v54  ;;  %v1996_v54 = vpop.permute.xlu1 %666 }
 0x106   : > { %1503 = vmatprep.mubr.msk.f32.mxu1 %vm759_vm3, %v553_v56 }
 0x107   : > { %v1998_v55 = vpop.permute.xlu0 %671 }
 0x109   : > { %v2000_v56 = vpop.permute.xlu1 %676 }
 0x1d4   : > { %v1464_v59 = vpop.f32.mrb[2].mxu1 }
 0x1d5   : > { %v518_v60 = vadd.f32 %v1464_v59, %v421_v58  ;;  %v512_v61 = vpop.f32.mrb[3].mxu1  ;;  %v2004_v58 = vpop.permute.xlu1 %686 }
 0x1d6   : > { %v513_v62 = vadd.f32 %v512_v61, %v416_v57  ;;  %v2002_v57 = vpop.permute.xlu0 %681 }
 0x1d7   : > { %1587 = vtanh.f32 %v518_v60 }
 0x1d8   : > { %1589 = vtanh.f32 %v513_v62  ;;  %v1467_v0 = vpop.f32.mrb[4].mxu1 }
 0x1d9   : > { %v528_v2 = vadd.f32 %v1467_v0, %v431_v63  ;;  %v522_v3 = vpop.f32.mrb[5].mxu1  ;;  %v697_v60 = vpop.permute.xlu1 %696 }
 0x1da   : > { %v523_v4 = vadd.f32 %v522_v3, %v426_v1  ;;  %v692_v59 = vpop.permute.xlu0 %691 }
 0x1db   : > { %1591 = vtanh.f32 %v528_v2 }
 0x1dc   : > { %1593 = vtanh.f32 %v523_v4 }
 0x1e1   : > { %v1588_v5 = vpop.eup %1587 }
 0x1e2   : > { %v1590_v6 = vpop.eup %1589 }
 0x1e3   : > { %v1528_v7 = vpack.c.bf16 %v1588_v5, %v1590_v6 }
 0x1e5   : > { %v1592_v8 = vpop.eup %1591  ;;  %1529 = vmatprep.subr.bf16.mxu0 %v1528_v7  ;;  %1536 = vmatprep.subr.bf16.mxu1 %v1528_v7 }
 0x1e6   : > { %v1594_v9 = vpop.eup %1593  ;;  %1531 = vmatpush3.bf16.msra.mxu0 %v1528_v7  ;;  %1538 = vmatpush3.bf16.msra.mxu1 %v1528_v7 }
 0x1e7   : > { %v1532_v10 = vpack.c.bf16 %v1592_v8, %v1594_v9  ;;  %v702_v9 = vpop.permute.xlu0 %701 }
 0x1e9   : > { %1533 = vmatprep.subr.bf16.mxu0 %v1532_v10  ;;  %1537 = vmatprep.subr.bf16.mxu1 %v1532_v10 }
 0x1ea   : > { %1535 = vmatpush3.bf16.msra.mxu0 %v1532_v10  ;;  %1539 = vmatpush3.bf16.msra.mxu1 %v1532_v10 }
 0x1ed   : > { %1477 = vmatmul.mubr.msk.f32.vlgmr.msra.gmra.mrb[0].mxu0 %vm759_vm3, %v536_v11  ;;  %1504 = vmatmul.mubr.msk.f32.vlgmr.msra.gmra.mrb[6].mxu1 %vm759_vm3, %v554_v12 }
 0x1ee   : > { %1479 = vmatprep.mubr.msk.f32.mxu0 %vm759_vm3, %v537_v13  ;;  %1506 = vmatprep.mubr.msk.f32.mxu1 %vm759_vm3, %v555_v14 }
 0x1f1   : > { %1480 = vmatmul.mubr.msk.f32.gmra.mrb[2].mxu0 %vm759_vm3, %v538_v15  ;;  %1507 = vmatmul.mubr.msk.f32.gmra.mrb[8].mxu1 %vm759_vm3, %v556_v16  ;;  %v707_v16 = vpop.permute.xlu1 %706 }
 0x1f2   : > { %1482 = vmatprep.mubr.msk.f32.mxu0 %vm759_vm3, %v539_v17  ;;  %1509 = vmatprep.mubr.msk.f32.mxu1 %vm759_vm3, %v557_v18 }
 0x1f5   : > { %1483 = vmatmul.mubr.msk.f32.gmra.mrb[4].mxu0 %vm759_vm3, %v540_v19  ;;  %1510 = vmatmul.mubr.msk.f32.gmra.mrb[10].mxu1 %vm759_vm3, %v558_v20 }
 0x1f6   : > { %1485 = vmatprep.mubr.msk.f32.mxu0 %vm759_vm3, %v541_v21  ;;  %1512 = vmatprep.mubr.msk.f32.mxu1 %vm759_vm3, %v559_v22 }
 0x1f9   : > { %1486 = vmatmul.mubr.msk.f32.gmra.mrb[6].mxu0 %vm759_vm3, %v542_v23  ;;  %1513 = vmatmul.mubr.msk.f32.gmra.mrb[12].mxu1 %vm759_vm3, %v560_v24  ;;  %v712_v23 = vpop.permute.xlu0 %711 }
 0x1fa   : > { %1488 = vmatprep.mubr.msk.f32.mxu0 %vm759_vm3, %v543_v25  ;;  %1515 = vmatprep.mubr.msk.f32.mxu1 %vm759_vm3, %v561_v26 }
 0x1fd   : > { %1489 = vmatmul.mubr.msk.f32.gmra.mrb[8].mxu0 %vm759_vm3, %v544_v27  ;;  %1516 = vmatmul.mubr.msk.f32.gmra.mrb[14].mxu1 %vm759_vm3, %v562_v28 }
 0x1fe   : > { %1491 = vmatprep.mubr.msk.f32.mxu0 %vm759_vm3, %v545_v29  ;;  %1518 = vmatprep.mubr.msk.f32.mxu1 %vm759_vm3, %v563_v30 }
 0x201   : > { %1492 = vmatmul.mubr.msk.f32.gmra.mrb[10].mxu0 %vm759_vm3, %v546_v31  ;;  %1519 = vmatmul.mubr.msk.f32.gmra.mrb[16].mxu1 %vm759_vm3, %v564_v32 }
 0x202   : > { %1494 = vmatprep.mubr.msk.f32.mxu0 %vm759_vm3, %v547_v33  ;;  %1521 = vmatprep.mubr.msk.f32.mxu1 %vm759_vm3, %v565_v34 }
 0x205   : > { %1495 = vmatmul.mubr.msk.f32.gmra.mrb[12].mxu0 %vm759_vm3, %v548_v35  ;;  %1522 = vmatmul.mubr.msk.f32.gmra.mrb[18].mxu1 %vm759_vm3, %v566_v36  ;;  %v722_v36 = vpop.permute.xlu0 %721 }
 0x206   : > { %1497 = vmatprep.mubr.msk.f32.mxu0 %vm759_vm3, %v549_v37  ;;  %v717_v37 = vpop.permute.xlu1 %716 }
 0x209   : > { %1498 = vmatmul.mubr.msk.f32.gmra.mrb[14].mxu0 %vm759_vm3, %v550_v38 }
 0x20a   : > { %1500 = vmatprep.mubr.msk.f32.mxu0 %vm759_vm3, %v551_v39 }
 0x20d   : > { %1501 = vmatmul.mubr.msk.f32.gmra.mrb[16].mxu0 %vm759_vm3, %v552_v40 }
 0x2c0   : > { %v1478_v61 = vpop.f32.mrb[0].mxu0  ;;  %v1505_v62 = vpop.f32.mrb[6].mxu1 }
 0x2c1   : > { %v928_v63 = vadd.f32 %v1478_v61, %v607_v42  ;;  %v1018_v0 = vadd.f32 %v1505_v62, %v697_v60  ;;  %v922_v1 = vpop.f32.mrb[1].mxu0  ;;  %v1012_v2 = vpop.f32.mrb[7].mxu1 }
 0x2c2   : > { %v923_v5 = vadd.f32 %v922_v1, %v602_v41  ;;  %v1013_v6 = vadd.f32 %v1012_v2, %v692_v59  ;;  %v732_v61 = vpop.permute.xlu0 %731  ;;  %v727_v62 = vpop.permute.xlu1 %726 }
 0x2c3   : > { %1119 = vmax.xlane.f32.xlu0 %v1018_v0  ;;  %1083 = vmax.xlane.f32.xlu1 %v928_v63 }
 0x2c4   : > { %v1481_v3 = vpop.f32.mrb[2].mxu0  ;;  %v1508_v4 = vpop.f32.mrb[8].mxu1 }
 0x2c5   : > { %v932_v7 = vpop.f32.mrb[3].mxu0  ;;  %v1022_v8 = vpop.f32.mrb[9].mxu1  ;;  %v938_v12 = vadd.f32 %v1481_v3, %v617_v44  ;;  %v1028_v19 = vadd.f32 %v1508_v4, %v707_v16 }
 0x2c6   : > { %v1023_v13 = vadd.f32 %v1022_v8, %v702_v9  ;;  %v933_v26 = vadd.f32 %v932_v7, %v612_v43 }
 0x2c7   : > { %1117 = vmax.xlane.f32.xlu1 %v1013_v6  ;;  %1081 = vmax.xlane.f32.xlu0 %v923_v5 }
 0x2c8   : > { %v1484_v10 = vpop.f32.mrb[4].mxu0  ;;  %v1511_v11 = vpop.f32.mrb[10].mxu1 }
 0x2c9   : > { %v942_v14 = vpop.f32.mrb[5].mxu0  ;;  %v1032_v15 = vpop.f32.mrb[11].mxu1  ;;  %v948_v32 = vadd.f32 %v1484_v10, %v627_v46  ;;  %v1038_v40 = vadd.f32 %v1511_v11, %v717_v37 }
 0x2ca   : > { %v943_v20 = vadd.f32 %v942_v14, %v622_v45  ;;  %v1033_v27 = vadd.f32 %v1032_v15, %v712_v23 }
 0x2cb   : > { %1121 = vmax.xlane.f32.xlu1 %v1023_v13  ;;  %1087 = vmax.xlane.f32.xlu0 %v938_v12 }
 0x2cc   : > { %v1487_v17 = vpop.f32.mrb[6].mxu0  ;;  %v1514_v18 = vpop.f32.mrb[12].mxu1 }
 0x2cd   : > { %v952_v21 = vpop.f32.mrb[7].mxu0  ;;  %v1042_v22 = vpop.f32.mrb[13].mxu1  ;;  %v958_v46 = vadd.f32 %v1487_v17, %v1984_v48  ;;  %v1048_v0 = vadd.f32 %v1514_v18, %v727_v62 }
 0x2ce   : > { %v953_v33 = vadd.f32 %v952_v21, %v632_v47  ;;  %v1043_v41 = vadd.f32 %v1042_v22, %v722_v36 }
 0x2cf   : > { %1089 = vmax.xlane.f32.xlu1 %v943_v20  ;;  %1123 = vmax.xlane.f32.xlu0 %v1028_v19 }
 0x2d0   : > { %v1490_v24 = vpop.f32.mrb[8].mxu0  ;;  %v1517_v25 = vpop.f32.mrb[14].mxu1 }
 0x2d1   : > { %v962_v28 = vpop.f32.mrb[9].mxu0  ;;  %v1052_v29 = vpop.f32.mrb[15].mxu1  ;;  %v968_v3 = vadd.f32 %v1490_v24, %v1988_v50 }
 0x2d2   : > { %v963_v47 = vadd.f32 %v962_v28, %v1986_v49  ;;  %v1053_v1 = vadd.f32 %v1052_v29, %v732_v61  ;;  %v742_v49 = vpop.permute.xlu0 %741 }
 0x2d3   : > { %1125 = vmax.xlane.f32.xlu1 %v1033_v27  ;;  %1085 = vmax.xlane.f32.xlu0 %v933_v26 }
 0x2d4   : > { %v1493_v30 = vpop.f32.mrb[10].mxu0  ;;  %v1520_v31 = vpop.f32.mrb[16].mxu1 }
 0x2d5   : > { %v972_v34 = vpop.f32.mrb[11].mxu0  ;;  %v1062_v35 = vpop.f32.mrb[17].mxu1  ;;  %v978_v6 = vadd.f32 %v1493_v30, %v1992_v52 }
 0x2d6   : > { %v973_v48 = vadd.f32 %v972_v34, %v1990_v51  ;;  %v1063_v5 = vadd.f32 %v1062_v35, %v742_v49  ;;  %v752_v9 = vpop.permute.xlu0 %751 }
 0x2d7   : > { %1093 = vmax.xlane.f32.xlu1 %v953_v33  ;;  %1091 = vmax.xlane.f32.xlu0 %v948_v32 }
 0x2d8   : > { %v1496_v38 = vpop.f32.mrb[12].mxu0  ;;  %v1523_v39 = vpop.f32.mrb[18].mxu1 }
 0x2d9   : > { %v988_v42 = vadd.f32 %v1496_v38, %v1996_v54  ;;  %v982_v43 = vpop.f32.mrb[13].mxu0  ;;  %v1072_v44 = vpop.f32.mrb[19].mxu1 }
 0x2da   : > { %v983_v7 = vadd.f32 %v982_v43, %v1994_v53  ;;  %v1073_v10 = vadd.f32 %v1072_v44, %v752_v9 }
 0x2db   : > { %1129 = vmax.xlane.f32.xlu1 %v1043_v41  ;;  %1127 = vmax.xlane.f32.xlu0 %v1038_v40 }
 0x2dc   : > { %v1499_v45 = vpop.f32.mrb[14].mxu0 }
 0x2dd   : > { %v998_v59 = vadd.f32 %v1499_v45, %v2000_v56  ;;  %v992_v60 = vpop.f32.mrb[15].mxu0  ;;  %v737_v56 = vpop.permute.xlu1 %736 }
 0x2de   : > { %v1058_v4 = vadd.f32 %v1517_v25, %v737_v56  ;;  %v993_v50 = vadd.f32 %v992_v60, %v1998_v55 }
 0x2df   : > { %1097 = vmax.xlane.f32.xlu1 %v963_v47  ;;  %1095 = vmax.xlane.f32.xlu0 %v958_v46 }
 0x2e0   : > { %v1502_v63 = vpop.f32.mrb[16].mxu0 }
 0x2e1   : > { %v1008_v54 = vadd.f32 %v1502_v63, %v2004_v58  ;;  %v1002_v2 = vpop.f32.mrb[17].mxu0  ;;  %v747_v58 = vpop.permute.xlu1 %746 }
 0x2e2   : > { %v1068_v8 = vadd.f32 %v1520_v31, %v747_v58  ;;  %v1003_v51 = vadd.f32 %v1002_v2, %v2002_v57 }
 0x2e3   : > { %1133 = vmax.xlane.f32.xlu1 %v1053_v1  ;;  %1131 = vmax.xlane.f32.xlu0 %v1048_v0 }
 0x2e5   : > { %v757_v52 = vpop.permute.xlu1 %756 }
 0x2e6   : > { %v1078_v11 = vadd.f32 %v1523_v39, %v757_v52 }
 0x2e7   : > { %1101 = vmax.xlane.f32.xlu1 %v973_v48  ;;  %1099 = vmax.xlane.f32.xlu0 %v968_v3 }
 0x2eb   : > { %1137 = vmax.xlane.f32.xlu1 %v1063_v5  ;;  %1135 = vmax.xlane.f32.xlu0 %v1058_v4 }
 0x2ef   : > { %1105 = vmax.xlane.f32.xlu1 %v983_v7  ;;  %1103 = vmax.xlane.f32.xlu0 %v978_v6 }
 0x2f3   : > { %1109 = vmax.xlane.f32.xlu1 %v993_v50  ;;  %1139 = vmax.xlane.f32.xlu0 %v1068_v8 }
 0x2f7   : > { %1113 = vmax.xlane.f32.xlu1 %v1003_v51  ;;  %1107 = vmax.xlane.f32.xlu0 %v988_v42 }
 0x2fb   : > { %1141 = vmax.xlane.f32.xlu1 %v1073_v10  ;;  %1111 = vmax.xlane.f32.xlu0 %v998_v59 }
 0x2ff   : > { %1115 = vmax.xlane.f32.xlu0 %v1008_v54 }
 0x303   : > { %1143 = vmax.xlane.f32.xlu0 %v1078_v11 }
 0x350   : > { %v2017_v53 = vpop.xlane.xlu0 %1119  ;;  %v2019_v12 = vpop.xlane.xlu1 %1083 }
 0x351   : > { %1151 = vst.msk [vmem:[%s1723_s20 + $0x8] sm:$0xff] (!%p1403_p7), %vm1149_vm4, %v2019_v12  ;;  %1169 = vst.msk [vmem:[%s1723_s20 + $0x98] sm:$0xff] (!%p1403_p7), %vm1149_vm4, %v2017_v53 }
 0x354   : > { %v2021_v13 = vpop.xlane.xlu1 %1117  ;;  %v2023_v55 = vpop.xlane.xlu0 %1081 }
 0x355   : > { %1150 = vst.msk [vmem:[%s1723_s20] sm:$0xff] (!%p1403_p7), %vm1149_vm4, %v2023_v55  ;;  %1168 = vst.msk [vmem:[%s1723_s20 + $0x90] sm:$0xff] (!%p1403_p7), %vm1149_vm4, %v2021_v13 }
 0x358   : > { %v2025_v14 = vpop.xlane.xlu1 %1121  ;;  %v2027_v57 = vpop.xlane.xlu0 %1087 }
 0x359   : > { %1153 = vst.msk [vmem:[%s1723_s20 + $0x18] sm:$0xff] (!%p1403_p7), %vm1149_vm4, %v2027_v57  ;;  %1170 = vst.msk [vmem:[%s1723_s20 + $0xa0] sm:$0xff] (!%p1403_p7), %vm1149_vm4, %v2025_v14 }
 0x35c   : > { %v2029_v15 = vpop.xlane.xlu1 %1089  ;;  %v2031_v16 = vpop.xlane.xlu0 %1123 }
 0x35d   : > { %1154 = vst.msk [vmem:[%s1723_s20 + $0x20] sm:$0xff] (!%p1403_p7), %vm1149_vm4, %v2029_v15  ;;  %1171 = vst.msk [vmem:[%s1723_s20 + $0xa8] sm:$0xff] (!%p1403_p7), %vm1149_vm4, %v2031_v16 }
 0x360   : > { %v2033_v17 = vpop.xlane.xlu1 %1125  ;;  %v2035_v18 = vpop.xlane.xlu0 %1085 }
 0x361   : > { %1152 = vst.msk [vmem:[%s1723_s20 + $0x10] sm:$0xff] (!%p1403_p7), %vm1149_vm4, %v2035_v18  ;;  %1172 = vst.msk [vmem:[%s1723_s20 + $0xb0] sm:$0xff] (!%p1403_p7), %vm1149_vm4, %v2033_v17 }
 0x364   : > { %v2037_v19 = vpop.xlane.xlu1 %1093  ;;  %v2039_v20 = vpop.xlane.xlu0 %1091 }
 0x365   : > { %1155 = vst.msk [vmem:[%s1723_s20 + $0x28] sm:$0xff] (!%p1403_p7), %vm1149_vm4, %v2039_v20  ;;  %1156 = vst.msk [vmem:[%s1723_s20 + $0x30] sm:$0xff] (!%p1403_p7), %vm1149_vm4, %v2037_v19 }
 0x368   : > { %v2041_v21 = vpop.xlane.xlu1 %1129  ;;  %v2043_v22 = vpop.xlane.xlu0 %1127 }
 0x369   : > { %1173 = vst.msk [vmem:[%s1723_s20 + $0xb8] sm:$0xff] (!%p1403_p7), %vm1149_vm4, %v2043_v22  ;;  %1174 = vst.msk [vmem:[%s1723_s20 + $0xc0] sm:$0xff] (!%p1403_p7), %vm1149_vm4, %v2041_v21 }
 0x36c   : > { %v2045_v23 = vpop.xlane.xlu1 %1097  ;;  %v2047_v24 = vpop.xlane.xlu0 %1095 }
 0x36d   : > { %1157 = vst.msk [vmem:[%s1723_s20 + $0x38] sm:$0xff] (!%p1403_p7), %vm1149_vm4, %v2047_v24  ;;  %1158 = vst.msk [vmem:[%s1723_s20 + $0x40] sm:$0xff] (!%p1403_p7), %vm1149_vm4, %v2045_v23 }
 0x370   : > { %v2049_v25 = vpop.xlane.xlu1 %1133  ;;  %v2051_v26 = vpop.xlane.xlu0 %1131 }
 0x371   : > { %1175 = vst.msk [vmem:[%s1723_s20 + $0xc8] sm:$0xff] (!%p1403_p7), %vm1149_vm4, %v2051_v26  ;;  %1176 = vst.msk [vmem:[%s1723_s20 + $0xd0] sm:$0xff] (!%p1403_p7), %vm1149_vm4, %v2049_v25 }
 0x374   : > { %v2053_v27 = vpop.xlane.xlu1 %1101  ;;  %v2055_v28 = vpop.xlane.xlu0 %1099 }
 0x375   : > { %1159 = vst.msk [vmem:[%s1723_s20 + $0x48] sm:$0xff] (!%p1403_p7), %vm1149_vm4, %v2055_v28  ;;  %1160 = vst.msk [vmem:[%s1723_s20 + $0x50] sm:$0xff] (!%p1403_p7), %vm1149_vm4, %v2053_v27 }
 0x378   : > { %v2057_v29 = vpop.xlane.xlu1 %1137  ;;  %v2059_v30 = vpop.xlane.xlu0 %1135 }
 0x379   : > { %1177 = vst.msk [vmem:[%s1723_s20 + $0xd8] sm:$0xff] (!%p1403_p7), %vm1149_vm4, %v2059_v30  ;;  %1178 = vst.msk [vmem:[%s1723_s20 + $0xe0] sm:$0xff] (!%p1403_p7), %vm1149_vm4, %v2057_v29 }
 0x37c   : > { %v2061_v31 = vpop.xlane.xlu1 %1105  ;;  %v2063_v32 = vpop.xlane.xlu0 %1103 }
 0x37d   : > { %1161 = vst.msk [vmem:[%s1723_s20 + $0x58] sm:$0xff] (!%p1403_p7), %vm1149_vm4, %v2063_v32  ;;  %1162 = vst.msk [vmem:[%s1723_s20 + $0x60] sm:$0xff] (!%p1403_p7), %vm1149_vm4, %v2061_v31 }
 0x380   : > { %v2065_v33 = vpop.xlane.xlu1 %1109  ;;  %v2067_v34 = vpop.xlane.xlu0 %1139 }
 0x381   : > { %1164 = vst.msk [vmem:[%s1723_s20 + $0x70] sm:$0xff] (!%p1403_p7), %vm1149_vm4, %v2065_v33  ;;  %1179 = vst.msk [vmem:[%s1723_s20 + $0xe8] sm:$0xff] (!%p1403_p7), %vm1149_vm4, %v2067_v34 }
 0x384   : > { %v2069_v35 = vpop.xlane.xlu1 %1113  ;;  %v2071_v36 = vpop.xlane.xlu0 %1107 }
 0x385   : > { %1163 = vst.msk [vmem:[%s1723_s20 + $0x68] sm:$0xff] (!%p1403_p7), %vm1149_vm4, %v2071_v36  ;;  %1166 = vst.msk [vmem:[%s1723_s20 + $0x80] sm:$0xff] (!%p1403_p7), %vm1149_vm4, %v2069_v35 }
 0x388   : > { %v2073_v37 = vpop.xlane.xlu1 %1141  ;;  %v2075_v38 = vpop.xlane.xlu0 %1111 }
 0x389   : > { %1165 = vst.msk [vmem:[%s1723_s20 + $0x78] sm:$0xff] (!%p1403_p7), %vm1149_vm4, %v2075_v38  ;;  %1180 = vst.msk [vmem:[%s1723_s20 + $0xf0] sm:$0xff] (!%p1403_p7), %vm1149_vm4, %v2073_v37 }
 0x38a   : > { %1148 = sbr.rel (%p1403_p7) target bundleno = 914 (0x392), region = 52 }
 0x38c   : > { %v2077_v39 = vpop.xlane.xlu0 %1115 }
 0x38d   : > { %1167 = vst.msk [vmem:[%s1723_s20 + $0x88] sm:$0xff] (!%p1403_p7), %vm1149_vm4, %v2077_v39 }
 0x390   : > { %v2079_v40 = vpop.xlane.xlu0 %1143 }
 0x391   : > { %1181 = vst.msk [vmem:[%s1723_s20 + $0xf8] sm:$0xff] %vm1149_vm4, %v2079_v40 }
 0x392 PF: > { %p1404_p8 = scmp.le.s32.totalorder %s1617_s24, 0 }
 0x393   : > { %v1186_v41 = vld [vmem:[%s1723_s20] sm:$0xff] (!%p1404_p8)  ;;  %vm1250_vm5 = vcmask (!%p1404_p8), 7168   ;;  %v1187_v42 = vld [vmem:[%s1723_s20 + $0x8] sm:$0xff] (!%p1404_p8)  ;;  %v1188_v43 = vld [vmem:[%s1723_s20 + $0x10] sm:$0xff] (!%p1404_p8) }
 0x394   : > { %1185 = sbr.rel (%p1404_p8) target bundleno = 934 (0x3a6), region = 56  ;;  %v1218_v44 = vmax.f32 (!%p1404_p8), %v1186_v41, %v2023_v55  ;;  %v1219_v45 = vmax.f32 (!%p1404_p8), %v1187_v42, %v2019_v12  ;;  %v1220_v46 = vmax.f32 (!%p1404_p8), %v1188_v43, %v2035_v18  ;;  %v1189_v47 = vld [vmem:[%s1723_s20 + $0x18] sm:$0xff] (!%p1404_p8)  ;;  %v1190_v59 = vld [vmem:[%s1723_s20 + $0x20] sm:$0xff] (!%p1404_p8)  ;;  %v1191_v60 = vld [vmem:[%s1723_s20 + $0x28] sm:$0xff] (!%p1404_p8) }
 0x395   : > { %v1221_v61 = vmax.f32 (!%p1404_p8), %v1189_v47, %v2027_v57  ;;  %v1222_v62 = vmax.f32 (!%p1404_p8), %v1190_v59, %v2029_v15  ;;  %v1223_v63 = vmax.f32 (!%p1404_p8), %v1191_v60, %v2039_v20  ;;  %v1192_v0 = vld [vmem:[%s1723_s20 + $0x30] sm:$0xff] (!%p1404_p8)  ;;  %v1193_v1 = vld [vmem:[%s1723_s20 + $0x38] sm:$0xff] (!%p1404_p8)  ;;  %v1194_v54 = vld [vmem:[%s1723_s20 + $0x40] sm:$0xff] (!%p1404_p8) }
 0x396   : > { %1251 = vst.msk [vmem:[%s1723_s20] sm:$0xff] (!%p1404_p8), %vm1250_vm5, %v1218_v44  ;;  %1252 = vst.msk [vmem:[%s1723_s20 + $0x8] sm:$0xff] (!%p1404_p8), %vm1250_vm5, %v1219_v45  ;;  %v1224_v2 = vmax.f32 (!%p1404_p8), %v1192_v0, %v2037_v19  ;;  %v1225_v3 = vmax.f32 (!%p1404_p8), %v1193_v1, %v2047_v24  ;;  %v1226_v48 = vmax.f32 (!%p1404_p8), %v1194_v54, %v2045_v23  ;;  %v1195_v49 = vld [vmem:[%s1723_s20 + $0x48] sm:$0xff] (!%p1404_p8)  ;;  %v1196_v56 = vld [vmem:[%s1723_s20 + $0x50] sm:$0xff] (!%p1404_p8) }
 0x397   : > { %1253 = vst.msk [vmem:[%s1723_s20 + $0x10] sm:$0xff] (!%p1404_p8), %vm1250_vm5, %v1220_v46  ;;  %v1197_v4 = vld [vmem:[%s1723_s20 + $0x58] sm:$0xff] (!%p1404_p8)  ;;  %1254 = vst.msk [vmem:[%s1723_s20 + $0x18] sm:$0xff] (!%p1404_p8), %vm1250_vm5, %v1221_v61  ;;  %v1227_v5 = vmax.f32 (!%p1404_p8), %v1195_v49, %v2055_v28  ;;  %v1228_v6 = vmax.f32 (!%p1404_p8), %v1196_v56, %v2053_v27  ;;  %v1198_v58 = vld [vmem:[%s1723_s20 + $0x60] sm:$0xff] (!%p1404_p8) }
 0x398   : > { %1255 = vst.msk [vmem:[%s1723_s20 + $0x20] sm:$0xff] (!%p1404_p8), %vm1250_vm5, %v1222_v62  ;;  %1256 = vst.msk [vmem:[%s1723_s20 + $0x28] sm:$0xff] (!%p1404_p8), %vm1250_vm5, %v1223_v63  ;;  %v1229_v7 = vmax.f32 (!%p1404_p8), %v1197_v4, %v2063_v32  ;;  %v1199_v8 = vld [vmem:[%s1723_s20 + $0x68] sm:$0xff] (!%p1404_p8)  ;;  %v1200_v50 = vld [vmem:[%s1723_s20 + $0x70] sm:$0xff] (!%p1404_p8)  ;;  %v1230_v51 = vmax.f32 (!%p1404_p8), %v1198_v58, %v2061_v31 }
 0x399   : > { %1257 = vst.msk [vmem:[%s1723_s20 + $0x30] sm:$0xff] (!%p1404_p8), %vm1250_vm5, %v1224_v2  ;;  %1258 = vst.msk [vmem:[%s1723_s20 + $0x38] sm:$0xff] (!%p1404_p8), %vm1250_vm5, %v1225_v3  ;;  %v1231_v9 = vmax.f32 (!%p1404_p8), %v1199_v8, %v2071_v36  ;;  %v1232_v10 = vmax.f32 (!%p1404_p8), %v1200_v50, %v2065_v33  ;;  %v1201_v52 = vld [vmem:[%s1723_s20 + $0x78] sm:$0xff] (!%p1404_p8)  ;;  %v1202_v11 = vld [vmem:[%s1723_s20 + $0x80] sm:$0xff] (!%p1404_p8) }
 0x39a   : > { %1259 = vst.msk [vmem:[%s1723_s20 + $0x40] sm:$0xff] (!%p1404_p8), %vm1250_vm5, %v1226_v48  ;;  %v1203_v12 = vld [vmem:[%s1723_s20 + $0x88] sm:$0xff] (!%p1404_p8)  ;;  %1260 = vst.msk [vmem:[%s1723_s20 + $0x48] sm:$0xff] (!%p1404_p8), %vm1250_vm5, %v1227_v5  ;;  %v1233_v55 = vmax.f32 (!%p1404_p8), %v1201_v52, %v2075_v38  ;;  %v1234_v57 = vmax.f32 (!%p1404_p8), %v1202_v11, %v2069_v35  ;;  %v1204_v18 = vld [vmem:[%s1723_s20 + $0x90] sm:$0xff] (!%p1404_p8) }
 0x39b   : > { %1261 = vst.msk [vmem:[%s1723_s20 + $0x50] sm:$0xff] %vm1250_vm5, %v1228_v6  ;;  %1262 = vst.msk [vmem:[%s1723_s20 + $0x58] sm:$0xff] %vm1250_vm5, %v1229_v7  ;;  %v1235_v15 = vmax.f32 %v1203_v12, %v2077_v39  ;;  %v1205_v19 = vld [vmem:[%s1723_s20 + $0x98] sm:$0xff]  ;;  %v1206_v20 = vld [vmem:[%s1723_s20 + $0xa0] sm:$0xff]  ;;  %v1236_v23 = vmax.f32 %v1204_v18, %v2021_v13 }
 0x39c   : > { %1263 = vst.msk [vmem:[%s1723_s20 + $0x60] sm:$0xff] %vm1250_vm5, %v1230_v51  ;;  %1264 = vst.msk [vmem:[%s1723_s20 + $0x68] sm:$0xff] %vm1250_vm5, %v1231_v9  ;;  %v1237_v24 = vmax.f32 %v1205_v19, %v2017_v53  ;;  %v1238_v27 = vmax.f32 %v1206_v20, %v2025_v14  ;;  %v1207_v28 = vld [vmem:[%s1723_s20 + $0xa8] sm:$0xff]  ;;  %v1208_v31 = vld [vmem:[%s1723_s20 + $0xb0] sm:$0xff] }
 0x39d   : > { %1265 = vst.msk [vmem:[%s1723_s20 + $0x70] sm:$0xff] %vm1250_vm5, %v1232_v10  ;;  %v1209_v32 = vld [vmem:[%s1723_s20 + $0xb8] sm:$0xff]  ;;  %1266 = vst.msk [vmem:[%s1723_s20 + $0x78] sm:$0xff] %vm1250_vm5, %v1233_v55  ;;  %v1239_v13 = vmax.f32 %v1207_v28, %v2031_v16  ;;  %v1240_v53 = vmax.f32 %v1208_v31, %v2033_v17  ;;  %v1210_v33 = vld [vmem:[%s1723_s20 + $0xc0] sm:$0xff] }
 0x39e   : > { %1267 = vst.msk [vmem:[%s1723_s20 + $0x80] sm:$0xff] %vm1250_vm5, %v1234_v57  ;;  %1268 = vst.msk [vmem:[%s1723_s20 + $0x88] sm:$0xff] %vm1250_vm5, %v1235_v15  ;;  %v1241_v14 = vmax.f32 %v1209_v32, %v2043_v22  ;;  %v1211_v35 = vld [vmem:[%s1723_s20 + $0xc8] sm:$0xff]  ;;  %v1212_v36 = vld [vmem:[%s1723_s20 + $0xd0] sm:$0xff]  ;;  %v1242_v16 = vmax.f32 %v1210_v33, %v2041_v21 }
 0x39f   : > { %1269 = vst.msk [vmem:[%s1723_s20 + $0x90] sm:$0xff] %vm1250_vm5, %v1236_v23  ;;  %1270 = vst.msk [vmem:[%s1723_s20 + $0x98] sm:$0xff] %vm1250_vm5, %v1237_v24  ;;  %v1243_v17 = vmax.f32 %v1211_v35, %v2051_v26  ;;  %v1244_v22 = vmax.f32 %v1212_v36, %v2049_v25  ;;  %v1213_v38 = vld [vmem:[%s1723_s20 + $0xd8] sm:$0xff]  ;;  %v1214_v39 = vld [vmem:[%s1723_s20 + $0xe0] sm:$0xff] }
 0x3a0   : > { %1271 = vst.msk [vmem:[%s1723_s20 + $0xa0] sm:$0xff] %vm1250_vm5, %v1238_v27  ;;  %v1215_v41 = vld [vmem:[%s1723_s20 + $0xe8] sm:$0xff]  ;;  %1272 = vst.msk [vmem:[%s1723_s20 + $0xa8] sm:$0xff] %vm1250_vm5, %v1239_v13  ;;  %v1245_v21 = vmax.f32 %v1213_v38, %v2059_v30  ;;  %v1246_v26 = vmax.f32 %v1214_v39, %v2057_v29  ;;  %v1216_v42 = vld [vmem:[%s1723_s20 + $0xf0] sm:$0xff] }
 0x3a1   : > { %1273 = vst.msk [vmem:[%s1723_s20 + $0xb0] sm:$0xff] %vm1250_vm5, %v1240_v53  ;;  %1274 = vst.msk [vmem:[%s1723_s20 + $0xb8] sm:$0xff] %vm1250_vm5, %v1241_v14  ;;  %v1247_v25 = vmax.f32 %v1215_v41, %v2067_v34  ;;  %v1217_v43 = vld [vmem:[%s1723_s20 + $0xf8] sm:$0xff]  ;;  %v1248_v44 = vmax.f32 %v1216_v42, %v2073_v37 }
 0x3a2   : > { %1275 = vst.msk [vmem:[%s1723_s20 + $0xc0] sm:$0xff] %vm1250_vm5, %v1242_v16  ;;  %1276 = vst.msk [vmem:[%s1723_s20 + $0xc8] sm:$0xff] %vm1250_vm5, %v1243_v17  ;;  %v1249_v45 = vmax.f32 %v1217_v43, %v2079_v40 }
 0x3a3   : > { %1277 = vst.msk [vmem:[%s1723_s20 + $0xd0] sm:$0xff] %vm1250_vm5, %v1244_v22  ;;  %1278 = vst.msk [vmem:[%s1723_s20 + $0xd8] sm:$0xff] %vm1250_vm5, %v1245_v21 }
 0x3a4   : > { %1279 = vst.msk [vmem:[%s1723_s20 + $0xe0] sm:$0xff] %vm1250_vm5, %v1246_v26  ;;  %1280 = vst.msk [vmem:[%s1723_s20 + $0xe8] sm:$0xff] %vm1250_vm5, %v1247_v25 }
 0x3a5   : > { %1281 = vst.msk [vmem:[%s1723_s20 + $0xf0] sm:$0xff] %vm1250_vm5, %v1248_v44  ;;  %1282 = vst.msk [vmem:[%s1723_s20 + $0xf8] sm:$0xff] %vm1250_vm5, %v1249_v45 }
 0x3a6 PF: > { %s17_s28 = sadd.s32 1, %s1633_s28   ;;  %s2330_s24 = smov %s1625_s26 }
 0x3a7   : > { %p14_p9 = scmp.ge.s32.totalorder %s17_s28, 10   ;;  %s2331_s25 = smov %s1629_s27 }
 0x3a8   : > { %s2332_s26 = smov %s2335_s29  ;;  %s2333_s27 = smov %s2339_s30 }
 0x3a9   :  { %16 = sbr.rel (!%p14_p9) target bundleno = 3 (0x3), region = 86 }

</bundles_post_ra>
